<compile_context>
chip_gen: v7x
topology: tpu7x:2x2x1
jax: 0.10.0
libtpu: 0.0.40
codegen_flags: <defaults>
</compile_context>

<pallas_src>
import jax
import jax.numpy as jnp
from jax.experimental import pallas as pl
from jax.experimental.pallas import tpu as pltpu


_VMEM_BUDGET = 40 << 20  # conservative tile budget; fits v7x's 64 MiB VMEM


def _round_up(x, m):
    return ((x + m - 1) // m) * m


def _linear_relu_kernel(x_ref, w_ref, b_ref, o_ref, acc_ref):
    # x_ref: (TM, TK), w_ref: (TK, TO), b_ref: (1, TO), o_ref/acc_ref: (TM, TO)
    @pl.when(pl.program_id(2) == 0)
    def _init():
        acc_ref[...] = jnp.zeros_like(acc_ref)

    acc_ref[...] += jnp.dot(x_ref[...], w_ref[...],
                            preferred_element_type=jnp.float32)

    @pl.when(pl.program_id(2) == pl.num_programs(2) - 1)
    def _finalize():
        # Fused bias + ReLU epilogue in f32, single store.
        o_ref[...] = jnp.maximum(acc_ref[...] + b_ref[...], 0.0).astype(o_ref.dtype)


def _choose_tiles(B, F, O, tm, max_tk, in_itemsize):
    # --- O (output-feature) axis: lane-dense 128-padding only when it pays.
    if O < 128:
        O_pad, TO = O, O                       # tiny O: full-dim block, no pad/slice
    else:
        O_pad = _round_up(O, 128)
        TO = 256 if O_pad % 256 == 0 else 128  # stream W in (TK, TO) tiles

    # --- K (reduction) axis: single step for moderate F, else 128-aligned tiles.
    if F <= max_tk:
        F_pad, TK = F, F
    else:
        TK = _round_up(max_tk, 128)
        F_pad = _round_up(F, TK)

    # --- M (batch) axis.
    TM = min(_round_up(tm, 8), _round_up(B, 8))

    def vmem_need(tm_):
        # double-buffered x / W / bias / out blocks + f32 accumulator scratch
        return ((2 * tm_ * TK + 2 * TK * TO) * in_itemsize
                + (2 * TO + 2 * tm_ * TO + tm_ * TO) * 4)

    while TM > 8 and vmem_need(TM) > _VMEM_BUDGET:
        TM = max(8, _round_up(TM // 2, 8))

    # Megacore (v7x): keep >= 2 batch tiles when the O axis gives no parallelism.
    if _round_up(B, TM) // TM < 2 and _round_up(B, 8) >= 16 and O_pad // TO < 2:
        half = _round_up((_round_up(B, 8) + 1) // 2, 8)
        TM = min(TM, half)
    B_pad = _round_up(B, TM)

    # Keep tail-tile waste under ~25% of the padded batch.
    while TM > 8 and (B_pad - B) * 4 > B_pad:
        TM = max(8, _round_up(TM // 2, 8))
        B_pad = _round_up(B, TM)

    return TM, TK, TO, B_pad, F_pad, O_pad, vmem_need(TM)


def logistic_regression_forward(x, weight, bias, *, tm=512, max_tk=2048,
                                compute_dtype=None, use_pallas=None):
    """Pallas TPU equivalent of torch: relu(x @ weight.T + bias).

    x:      (B, F) float32
    weight: (O, F) float32 (PyTorch nn.Linear layout)
    bias:   (O,)   float32
    """
    B, F = x.shape
    O = weight.shape[0]

    # Tiny problems: kernel launch + per-step overhead dominates; let XLA fuse.
    if use_pallas is None:
        use_pallas = B * F * O >= (1 << 20)
    if not use_pallas:
        return jnp.maximum(x @ weight.T + bias[None, :], 0.0)

    in_dtype = jnp.dtype(compute_dtype) if compute_dtype is not None else x.dtype
    TM, TK, TO, B_pad, F_pad, O_pad, vmem_need = _choose_tiles(
        B, F, O, tm, max_tk, in_dtype.itemsize)

    # One-time layout work outside the kernel: W.T -> (F, O) so the contraction
    # is (M, K) @ (K, N); zero padding is exact (0-contribution, relu(0)=0).
    w_t = weight.T
    x_p = x
    if (B_pad, F_pad) != (B, F):
        x_p = jnp.pad(x_p, ((0, B_pad - B), (0, F_pad - F)))
    if (F_pad, O_pad) != (F, O):
        w_t = jnp.pad(w_t, ((0, F_pad - F), (0, O_pad - O)))
    b_p = bias if O_pad == O else jnp.pad(bias, (0, O_pad - O))
    b_p = b_p.reshape(1, O_pad).astype(jnp.float32)
    if compute_dtype is not None:  # optional bf16 streaming, f32 accumulation
        x_p = x_p.astype(compute_dtype)
        w_t = w_t.astype(compute_dtype)

    nb, no, nk = B_pad // TM, O_pad // TO, F_pad // TK

    cost = pl.CostEstimate(
        flops=2 * B_pad * F_pad * O_pad,
        transcendentals=0,
        bytes_accessed=(x_p.dtype.itemsize * (B_pad * F_pad + F_pad * O_pad)
                        + 4 * (O_pad + B_pad * O_pad)),
    )

    out_pad = pl.pallas_call(
        _linear_relu_kernel,
        out_shape=jax.ShapeDtypeStruct((B_pad, O_pad), jnp.float32),
        grid_spec=pltpu.PrefetchScalarGridSpec(
            num_scalar_prefetch=0,
            grid=(nb, no, nk),
            in_specs=[
                pl.BlockSpec((TM, TK), lambda i, j, k: (i, k)),  # x stream
                pl.BlockSpec((TK, TO), lambda i, j, k: (k, j)),  # W.T stream
                pl.BlockSpec((1, TO), lambda i, j, k: (0, j)),   # bias
            ],
            out_specs=pl.BlockSpec((TM, TO), lambda i, j, k: (i, j)),
            scratch_shapes=[pltpu.VMEM((TM, TO), jnp.float32)],
        ),
        compiler_params=pltpu.CompilerParams(
            dimension_semantics=("parallel", "parallel", "arbitrary"),
            vmem_limit_bytes=int(min(max(vmem_need + (4 << 20), 32 << 20),
                                     48 << 20)),
        ),
        cost_estimate=cost,
    )(x_p, w_t, b_p)

    if (B_pad, O_pad) != (B, O):
        return out_pad[:B, :O]
    return out_pad


if __name__ == "__main__":
    key0, key1 = jax.random.split(jax.random.PRNGKey(0), 2)

    def make_inputs(key, batch, input_size, output_size):
        kx, kw, kb = jax.random.split(key, 3)
        bound = 1.0 / jnp.sqrt(jnp.float32(input_size))
        x = jax.random.normal(kx, (batch, input_size), dtype=jnp.float32)
        w = jax.random.uniform(kw, (output_size, input_size),
                               minval=-bound, maxval=bound, dtype=jnp.float32)
        b = jax.random.uniform(kb, (output_size,),
                               minval=-bound, maxval=bound, dtype=jnp.float32)
        return x, w, b

    # 1) Small shapes matching LogisticRegression(input_size=32, output_size=2);
    #    force the Pallas path so the kernel itself is exercised.
    x, w, b = make_inputs(key0, 8, 32, 2)
    out = logistic_regression_forward(x, w, b, use_pallas=True)
    jax.block_until_ready(out)
    ref = jnp.maximum(x @ w.T + b, 0.0)
    assert out.shape == ref.shape
    assert jnp.allclose(out, ref, atol=1e-5, rtol=1e-5)

    # 2) Modest case exercising batch, output-feature and K-reduction grid axes
    #    (max_tk lowered so the accumulator path runs cheaply).
    x2, w2, b2 = make_inputs(key1, 300, 640, 200)
    out2 = logistic_regression_forward(x2, w2, b2, max_tk=256, use_pallas=True)
    jax.block_until_ready(out2)
    ref2 = jnp.maximum(x2 @ w2.T + b2, 0.0)
    assert out2.shape == ref2.shape
    assert jnp.allclose(out2, ref2, atol=1e-4, rtol=1e-4)

    # 3) Default small-shape fast path (plain XLA) sanity check.
    out3 = logistic_regression_forward(x, w, b)
    jax.block_until_ready(out3)
    assert jnp.allclose(out3, ref, atol=1e-5, rtol=1e-5)

    print("KERNEL_OK")
</pallas_src>

<mosaic_0001>
module attributes {stable_mosaic.version = 11 : i64} {
  func.func @_linear_relu_kernel(%arg0: i32, %arg1: i32, %arg2: i32, %arg3: memref<8x32xf32, #tpu.memory_space<vmem>>, %arg4: memref<32x2xf32, #tpu.memory_space<vmem>>, %arg5: memref<1x2xf32, #tpu.memory_space<vmem>>, %arg6: memref<8x2xf32, #tpu.memory_space<vmem>>, %arg7: memref<8x2xf32, #tpu.memory_space<vmem>>) attributes {dimension_semantics = [#tpu.dimension_semantics<parallel>, #tpu.dimension_semantics<parallel>, #tpu.dimension_semantics<arbitrary>], iteration_bounds = array<i64: 1, 1, 1>, scalar_prefetch = 0 : i64, scratch_operands = 1 : i64, tpu.core_type = #tpu.core_type<tc>, window_params = [{transform_indices = @transform_0, window_bounds = array<i64: 8, 32>}, {transform_indices = @transform_1, window_bounds = array<i64: 32, 2>}, {transform_indices = @transform_2, window_bounds = array<i64: 1, 2>}, {transform_indices = @transform_3, window_bounds = array<i64: 8, 2>}]} {
    %c0_i32 = arith.constant 0 : i32
    %0 = arith.cmpi eq, %arg2, %c0_i32 : i32
    %1 = arith.extui %0 : i1 to i32
    %c0_i32_0 = arith.constant 0 : i32
    %2 = arith.cmpi ne, %1, %c0_i32_0 : i32
    scf.if %2 {
      %cst_10 = arith.constant 0.000000e+00 : f32
      %12 = vector.broadcast %cst_10 : f32 to vector<8x2xf32>
      %c0_11 = arith.constant 0 : index
      %c0_12 = arith.constant 0 : index
      %13 = vector.load %arg7[%c0_11, %c0_12] : memref<8x2xf32, #tpu.memory_space<vmem>>, vector<8x2xf32>
      tpu.vector_store %arg7[%c0_11, %c0_12], %12 {strides = array<i32>} : memref<8x2xf32, #tpu.memory_space<vmem>>, vector<8x2xf32>,
    } else {
    }
    %c0 = arith.constant 0 : index
    %c0_1 = arith.constant 0 : index
    %3 = vector.load %arg7[%c0, %c0_1] : memref<8x2xf32, #tpu.memory_space<vmem>>, vector<8x2xf32>
    %c0_2 = arith.constant 0 : index
    %c0_3 = arith.constant 0 : index
    %4 = vector.load %arg3[%c0_2, %c0_3] : memref<8x32xf32, #tpu.memory_space<vmem>>, vector<8x32xf32>
    %c0_4 = arith.constant 0 : index
    %c0_5 = arith.constant 0 : index
    %5 = vector.load %arg4[%c0_4, %c0_5] : memref<32x2xf32, #tpu.memory_space<vmem>>, vector<32x2xf32>
    %cst = arith.constant dense<0.000000e+00> : vector<8x2xf32>
    %6 = tpu.matmul %4, %5, %cst {dimension_numbers = #tpu.dot_dimension_numbers<[1], [0], [0], [1], [0, 0, 1, 1], [], []>} : vector<8x32xf32>, vector<32x2xf32>, vector<8x2xf32> -> vector<8x2xf32>
    %7 = arith.addf %3, %6 : vector<8x2xf32>
    %c0_6 = arith.constant 0 : index
    %c0_7 = arith.constant 0 : index
    %8 = vector.load %arg7[%c0_6, %c0_7] : memref<8x2xf32, #tpu.memory_space<vmem>>, vector<8x2xf32>
    tpu.vector_store %arg7[%c0_6, %c0_7], %7 {strides = array<i32>} : memref<8x2xf32, #tpu.memory_space<vmem>>, vector<8x2xf32>,
    %c0_i32_8 = arith.constant 0 : i32
    %9 = arith.cmpi eq, %arg2, %c0_i32_8 : i32
    %10 = arith.extui %9 : i1 to i32
    %c0_i32_9 = arith.constant 0 : i32
    %11 = arith.cmpi ne, %10, %c0_i32_9 : i32
    scf.if %11 {
      %c0_10 = arith.constant 0 : index
      %c0_11 = arith.constant 0 : index
      %12 = vector.load %arg7[%c0_10, %c0_11] : memref<8x2xf32, #tpu.memory_space<vmem>>, vector<8x2xf32>
      %c0_12 = arith.constant 0 : index
      %c0_13 = arith.constant 0 : index
      %13 = vector.load %arg5[%c0_12, %c0_13] : memref<1x2xf32, #tpu.memory_space<vmem>>, vector<1x2xf32>
      %14 = vector.broadcast %13 : vector<1x2xf32> to vector<8x2xf32>
      %15 = arith.addf %12, %14 : vector<8x2xf32>
      %cst_14 = arith.constant 0.000000e+00 : f32
      %16 = vector.broadcast %cst_14 : f32 to vector<8x2xf32>
      %17 = arith.maximumf %15, %16 : vector<8x2xf32>
      %c0_15 = arith.constant 0 : index
      %c0_16 = arith.constant 0 : index
      %18 = vector.load %arg6[%c0_15, %c0_16] : memref<8x2xf32, #tpu.memory_space<vmem>>, vector<8x2xf32>
      tpu.vector_store %arg6[%c0_15, %c0_16], %17 {strides = array<i32>} : memref<8x2xf32, #tpu.memory_space<vmem>>, vector<8x2xf32>,
    } else {
    }
    return
  }
  func.func @transform_0(%arg0: i32, %arg1: i32, %arg2: i32) -> (i32, i32) {
    %c0_i32 = arith.constant 0 : i32
    return %arg0, %arg2 : i32, i32
  }
  func.func @transform_1(%arg0: i32, %arg1: i32, %arg2: i32) -> (i32, i32) {
    %c0_i32 = arith.constant 0 : i32
    return %arg2, %arg1 : i32, i32
  }
  func.func @transform_2(%arg0: i32, %arg1: i32, %arg2: i32) -> (i32, i32) {
    %c0_i32 = arith.constant 0 : i32
    %c0_i32_0 = arith.constant 0 : i32
    return %c0_i32, %arg1 : i32, i32
  }
  func.func @transform_3(%arg0: i32, %arg1: i32, %arg2: i32) -> (i32, i32) {
    %c0_i32 = arith.constant 0 : i32
    return %arg0, %arg1 : i32, i32
  }
}

</mosaic_0001>

<bundles_post_ra>
// kernel: tpu_custom_call.1
= control target key start
LH: loop header
LB: loop body
LE: loop exit
PB: predicated region body
PF: predicated region fallthrough
CT: control target
= control target key end

     0   :  { %vm18_vm0 = vcmask 15360   ;;  %v148_v0 = vmov 0.0|0.0   ;;  %v149_v4 = vmov 0.0   ;;  %vm150_vm1 = vmmov 0   ;;  %s195_s1 = inlined_call_operand.vmem [shape: f32[32,2], index: 1, kind: input, shape index: {}]   ;;  %s196_s0 = inlined_call_operand.vmem [shape: f32[8,32], index: 0, kind: input, shape index: {}]   ;;  %s197_s2 = inlined_call_operand.vmem [shape: f32[1,2], index: 2, kind: input, shape index: {}]   ;;  %s198_s3 = inlined_call_operand.vmem [shape: f32[8,2], index: 3, kind: output, shape index: {}]  }
   0x1   :  { %139 = vmatprep.subr.bf16.mxu0 %v148_v0  ;;  %v22_v1 = vld [vmem:[%s195_s1] sm:$0xff]  ;;  %v23_v2 = vld [vmem:[%s195_s1 + $0x8] sm:$0xff]  ;;  %v24_v3 = vld [vmem:[%s195_s1 + $0x10] sm:$0xff]  ;;  %19 = vst.msk [vmem:[#allocation2] sm:$0xff] %vm18_vm0, %v149_v4  ;;  %136 = vmatprep.mubr.msk.f32.mxu0 %vm150_vm1, %v149_v4  ;;  %vm26_vm2 = vcmask 261120  }
   0x2   :  { %v140_v5 = vpack.c.bf16 %v23_v2, %v22_v1  ;;  %v25_v6 = vld [vmem:[%s195_s1 + $0x18] sm:$0xff]  ;;  %v21_v8 = vld [vmem:[%s196_s0] sm:$0xff] }
   0x3   :  { %v143_v7 = vpack.c.bf16 %v25_v6, %v24_v3  ;;  %v122_v13 = vld [vmem:[%s197_s2] ss:$0 sm:$0xff] }
   0x4   :  { %141 = vmatpush3.bf16.msra.mxu0 %v140_v5 }
   0x5   :  { %142 = vmatprep.subr.bf16.mxu0 %v148_v0 }
   0x8   :  { %144 = vmatpush3.bf16.msra.mxu0 %v143_v7  ;;  %v20_v9 = vld [vmem:[#allocation2] sm:$0xff] }
   0xb   :  { %137 = vmatmul.mubr.msk.f32.vlgmr.msra.gmra.mrb[0].mxu0 %vm26_vm2, %v21_v8 }
  0xde   :  { %v96_v10 = vpop.f32.mrb[0].mxu0 }
  0xdf   :  { %v100_v11 = vadd.f32 %v96_v10, %v20_v9  ;;  %v138_v12 = vpop.f32.mrb[1].mxu0 }
  0xe1   :  { %102 = vst.msk [vmem:[#allocation2] sm:$0xff] %vm18_vm0, %v100_v11 }
  0xe8   :  { %v106_v14 = vld [vmem:[#allocation2] sm:$0xff] }
  0xe9   :  { %v114_v15 = vadd.f32 %v122_v13, %v106_v14 }
  0xeb   :  { %v115_v16 = vmax.f32 %v114_v15, 0.0 }
  0xed   :  { %116 = vst.msk [vmem:[%s198_s3] sm:$0xff] %vm18_vm0, %v115_v16 }

</bundles_post_ra>
